<compile_context>
chip_gen: v6e
topology: v6e:2x2x1
jax: 0.10.0
libtpu: 0.0.40
codegen_flags: <defaults>
</compile_context>

<pallas_src>
import functools

import jax
import jax.numpy as jnp
from jax.experimental import pallas as pl
from jax.experimental.pallas import tpu as pltpu


def _round_up(n, m):
    return ((n + m - 1) // m) * m


def _l2_normalize_rows(w, eps=1e-6):
    # Mirrors F.normalize(w, dim=-1, p=2, eps=eps) used by LinearNormWeight.
    norm = jnp.sqrt(jnp.sum(w * w, axis=-1, keepdims=True))
    return w / jnp.maximum(norm, eps)


# ---------------------------------------------------------------------------
# Kernel
# ---------------------------------------------------------------------------
def _ffn_kernel(x_ref, w13_ref, w2_ref, o_ref, acc_ref, *, th):
    # x_ref:   (tm, C)      f32 token tile (invariant across the reduction axis)
    # w13_ref: (C, 2*th)    bf16 interleaved [gate_k | up_k] column block
    # w2_ref:  (th, C)      bf16 down-projection row block
    # o_ref:   (tm, C)      output tile (written on the last reduction step)
    # acc_ref: (tm, C)      f32 accumulator scratch
    k = pl.program_id(1)

    @pl.when(k == 0)
    def _():
        acc_ref[...] = jnp.zeros_like(acc_ref)

    # bf16 cast in-kernel (VPU work hidden under the MXU passes).
    x = x_ref[...].astype(jnp.bfloat16)

    # One MXU pass for this H-block's gate+up columns: (tm, C) @ (C, 2*th).
    uv = jnp.dot(x, w13_ref[...], preferred_element_type=jnp.float32)
    u = uv[:, :th]            # static lane slices (th is a multiple of 128)
    v = uv[:, th:]

    # SiLU(v) * u in f32 (EUP sigmoid + VPU muls hide under the MXU work).
    h = (v * jax.nn.sigmoid(v)) * u

    # Partial down-projection for this H-block, accumulate in f32.
    acc_ref[...] += jnp.dot(h.astype(w2_ref.dtype), w2_ref[...],
                            preferred_element_type=jnp.float32)

    @pl.when(k == pl.num_programs(1) - 1)
    def _():
        o_ref[...] = acc_ref[...].astype(o_ref.dtype)


# ---------------------------------------------------------------------------
# Host-side weight prep (hoist this out of the per-forward path and cache it;
# it only needs to run once per weight update).
# ---------------------------------------------------------------------------
def prepare_ffn_weights(w1, w2, w3, scale_u, scale_v, *, groups=1, th=512):
    """Fold scales into the weights and build the interleaved fused gate/up
    weight.  Returns (w13, w2t, th).

    Semantics being folded (matching the PyTorch module; each LinearNormWeight
    applies its own 1/groups factor, so the overall (1/groups)^3 is intended):
        u = (x @ w1.T) * (1/groups) * scale_u
        v = (x @ w3.T) * (1/groups) * scale_v * sqrt(H)
        out = (silu(v) * u) @ w2.T * (1/groups)
    """
    H, C = w1.shape
    assert H % 128 == 0, "hidden dim must be a multiple of 128 (TPU lane width)"

    # Pick th: a multiple of 128 that divides H, no larger than requested.
    th = max(128, min(int(th), H))
    th = (th // 128) * 128
    while H % th:
        th -= 128
    n_groups = H // th

    lin_scale = 1.0 / float(groups)          # LinearNormWeight scale (groups ** -1)
    hidden_scale = float(H) ** 0.5           # self.scale_ in FeedForward

    su = scale_u.astype(jnp.float32) * lin_scale
    sv = scale_v.astype(jnp.float32) * lin_scale * hidden_scale

    w1s = (w1.T.astype(jnp.float32) * su[None, :]).astype(jnp.bfloat16)   # (C, H)
    w3s = (w3.T.astype(jnp.float32) * sv[None, :]).astype(jnp.bfloat16)   # (C, H)

    # Interleave gate/up per th-group: column block k of the result is the
    # contiguous, lane-dense [gate_k (th cols) | up_k (th cols)] pair.
    w13 = jnp.concatenate(
        [w1s.reshape(C, n_groups, 1, th), w3s.reshape(C, n_groups, 1, th)],
        axis=2,
    ).reshape(C, 2 * H)

    w2t = (w2.T.astype(jnp.float32) * lin_scale).astype(jnp.bfloat16)     # (H, C)
    return w13, w2t, th


# ---------------------------------------------------------------------------
# Pallas wrapper
# ---------------------------------------------------------------------------
def feed_forward_pallas(x, w13, w2t, th, *, tm=256, out_dtype=None):
    """x: (B, T, C).  w13: (C, 2H) interleaved bf16.  w2t: (H, C) bf16."""
    B, T, C = x.shape
    H = w2t.shape[0]
    assert w13.shape == (C, 2 * H) and H % th == 0
    M = B * T
    out_dtype = out_dtype if out_dtype is not None else x.dtype
    n_groups = H // th

    # ---- row tiling --------------------------------------------------------
    # Multiple of 16 (bf16 sublane pack; also satisfies the f32 (8,128) rule),
    # clamped so there are >=2 row-grid steps when M allows it (megacore on
    # v7x), and never larger than the (16-rounded) token count.
    tm = min(tm, _round_up(M, 16))
    if M >= 32:
        tm = min(tm, _round_up((M + 1) // 2, 16))
    tm = _round_up(max(tm, 16), 16)

    M_pad = _round_up(M, tm)
    x2d = x.reshape(M, C)
    if M_pad != M:  # pad only when needed -> no extra HBM pass in the common case
        x2d = jnp.pad(x2d, ((0, M_pad - M), (0, 0)))

    # ---- VMEM budget -------------------------------------------------------
    out_bytes = jnp.dtype(out_dtype).itemsize
    vmem_bytes = (
        2 * tm * C * 4              # x tile, double-buffered (f32)
        + 2 * C * (2 * th) * 2      # w13 column block (bf16), double-buffered
        + 2 * th * C * 2            # w2 row block (bf16), double-buffered
        + 2 * tm * C * out_bytes    # output tile, double-buffered
        + tm * C * 4                # f32 accumulator scratch
        + 4 * tm * (2 * th) * 4     # uv / silu intermediates + headroom
    )
    vmem_limit = min(max(int(vmem_bytes * 1.25), 32 << 20), 64 << 20)

    out2d = pl.pallas_call(
        functools.partial(_ffn_kernel, th=th),
        out_shape=jax.ShapeDtypeStruct((M_pad, C), out_dtype),
        grid_spec=pltpu.PrefetchScalarGridSpec(
            num_scalar_prefetch=0,
            grid=(M_pad // tm, n_groups),            # reduction axis last
            in_specs=[
                pl.BlockSpec((tm, C), lambda i, k: (i, 0)),       # token tile
                pl.BlockSpec((C, 2 * th), lambda i, k: (0, k)),   # fused gate/up block
                pl.BlockSpec((th, C), lambda i, k: (k, 0)),       # down-proj row block
            ],
            out_specs=pl.BlockSpec((tm, C), lambda i, k: (i, 0)),
            scratch_shapes=[pltpu.VMEM((tm, C), jnp.float32)],
        ),
        compiler_params=pltpu.CompilerParams(
            dimension_semantics=("parallel", "arbitrary"),
            vmem_limit_bytes=vmem_limit,
        ),
    )(x2d, w13, w2t)

    if M_pad != M:
        out2d = out2d[:M]
    return out2d.reshape(B, T, C)


def feed_forward(x, w1, w2, w3, scale_u, scale_v, *, groups=1, tm=256, th=512):
    """Convenience one-shot path (prep + kernel).  For repeated forwards, call
    prepare_ffn_weights once and reuse its outputs with feed_forward_pallas."""
    w13, w2t, th = prepare_ffn_weights(w1, w2, w3, scale_u, scale_v,
                                       groups=groups, th=th)
    return feed_forward_pallas(x, w13, w2t, th, tm=tm)


def feed_forward_reference(x, w1, w2, w3, scale_u, scale_v, *, groups=1):
    # Pure-f32 reference matching the PyTorch module's forward.
    H = w1.shape[0]
    g = 1.0 / float(groups)
    u = jnp.einsum("btc,hc->bth", x, w1) * g * scale_u
    v = jnp.einsum("btc,hc->bth", x, w3) * g * scale_v
    v = v * (float(H) ** 0.5)
    h = v * jax.nn.sigmoid(v) * u
    return jnp.einsum("bth,ch->btc", h, w2) * g


if __name__ == "__main__":
    # Small shapes consistent with the module: n_embd=32, factor=4 -> hidden=128.
    B, T, C = 2, 8, 32
    H = 4 * C  # 128

    key = jax.random.PRNGKey(0)
    kx, k1, k2, k3 = jax.random.split(key, 4)

    x = jax.random.normal(kx, (B, T, C), dtype=jnp.float32)

    # Deterministic weights; L2-normalize rows as LinearNormWeight.norm_weight_ does.
    w1 = _l2_normalize_rows(jax.random.normal(k1, (H, C), dtype=jnp.float32) * 0.02)
    w2 = _l2_normalize_rows(jax.random.normal(k2, (C, H), dtype=jnp.float32) * 0.02)
    w3 = _l2_normalize_rows(jax.random.normal(k3, (H, C), dtype=jnp.float32) * 0.02)

    # Scale modules: params = ones(H) * scale; forward() = params * (init_scale / scale).
    # With FFConfig defaults (init_scale=1, scale=1) this is ones(H).
    scale_u = jnp.ones((H,), dtype=jnp.float32)
    scale_v = jnp.ones((H,), dtype=jnp.float32)

    # One-time weight prep (cache across forwards in real use).
    w13, w2t, th = prepare_ffn_weights(w1, w2, w3, scale_u, scale_v, groups=1)

    out = feed_forward_pallas(x, w13, w2t, th)
    out = jax.block_until_ready(out)

    ref = feed_forward_reference(x, w1, w2, w3, scale_u, scale_v)
    # bf16 matmul inputs -> compare with a tolerance scaled to the output range.
    max_err = float(jnp.max(jnp.abs(out - ref)))
    out_scale = float(jnp.max(jnp.abs(ref)))
    assert max_err <= 5e-2 * out_scale, (
        f"mismatch vs reference: max_err={max_err}, ref_scale={out_scale}")

    print("KERNEL_OK")
</pallas_src>

<mosaic_0001>
module attributes {stable_mosaic.version = 11 : i64} {
  func.func @_ffn_kernel(%arg0: i32, %arg1: i32, %arg2: memref<16x32xf32, #tpu.memory_space<vmem>>, %arg3: memref<32x256xbf16, #tpu.memory_space<vmem>>, %arg4: memref<128x32xbf16, #tpu.memory_space<vmem>>, %arg5: memref<16x32xf32, #tpu.memory_space<vmem>>, %arg6: memref<16x32xf32, #tpu.memory_space<vmem>>) attributes {dimension_semantics = [#tpu.dimension_semantics<parallel>, #tpu.dimension_semantics<arbitrary>], iteration_bounds = array<i64: 1, 1>, scalar_prefetch = 0 : i64, scratch_operands = 1 : i64, tpu.core_type = #tpu.core_type<tc>, window_params = [{transform_indices = @transform_0, window_bounds = array<i64: 16, 32>}, {transform_indices = @transform_1, window_bounds = array<i64: 32, 256>}, {transform_indices = @transform_2, window_bounds = array<i64: 128, 32>}, {transform_indices = @transform_3, window_bounds = array<i64: 16, 32>}]} {
    %c0_i32 = arith.constant 0 : i32
    %0 = arith.cmpi eq, %arg1, %c0_i32 : i32
    %1 = arith.extui %0 : i1 to i32
    %c0_i32_0 = arith.constant 0 : i32
    %2 = arith.cmpi ne, %1, %c0_i32_0 : i32
    scf.if %2 {
      %cst_14 = arith.constant 0.000000e+00 : f32
      %25 = vector.broadcast %cst_14 : f32 to vector<16x32xf32>
      %c0_15 = arith.constant 0 : index
      %c0_16 = arith.constant 0 : index
      %26 = vector.load %arg6[%c0_15, %c0_16] : memref<16x32xf32, #tpu.memory_space<vmem>>, vector<16x32xf32>
      tpu.vector_store %arg6[%c0_15, %c0_16], %25 {strides = array<i32>} : memref<16x32xf32, #tpu.memory_space<vmem>>, vector<16x32xf32>,
    } else {
    }
    %c0 = arith.constant 0 : index
    %c0_1 = arith.constant 0 : index
    %3 = vector.load %arg2[%c0, %c0_1] : memref<16x32xf32, #tpu.memory_space<vmem>>, vector<16x32xf32>
    %4 = arith.truncf %3 : vector<16x32xf32> to vector<16x32xbf16>
    %c0_2 = arith.constant 0 : index
    %c0_3 = arith.constant 0 : index
    %5 = vector.load %arg3[%c0_2, %c0_3] : memref<32x256xbf16, #tpu.memory_space<vmem>>, vector<32x256xbf16>
    %cst = arith.constant dense<0.000000e+00> : vector<16x256xf32>
    %6 = tpu.matmul %4, %5, %cst {dimension_numbers = #tpu.dot_dimension_numbers<[1], [0], [0], [1], [0, 0, 1, 1], [], []>} : vector<16x32xbf16>, vector<32x256xbf16>, vector<16x256xf32> -> vector<16x256xf32>
    %7 = vector.extract_strided_slice %6 {offsets = [0, 0], sizes = [16, 128], strides = [1, 1]} : vector<16x256xf32> to vector<16x128xf32>
    %8 = vector.extract_strided_slice %6 {offsets = [0, 128], sizes = [16, 128], strides = [1, 1]} : vector<16x256xf32> to vector<16x128xf32>
    %9 = arith.negf %8 : vector<16x128xf32>
    %10 = math.exp %9 : vector<16x128xf32>
    %cst_4 = arith.constant 1.000000e+00 : f32
    %11 = vector.broadcast %cst_4 : f32 to vector<16x128xf32>
    %12 = arith.addf %11, %10 : vector<16x128xf32>
    %13 = arith.divf %11, %12 : vector<16x128xf32>
    %14 = arith.mulf %8, %13 : vector<16x128xf32>
    %15 = arith.mulf %14, %7 : vector<16x128xf32>
    %c0_5 = arith.constant 0 : index
    %c0_6 = arith.constant 0 : index
    %16 = vector.load %arg6[%c0_5, %c0_6] : memref<16x32xf32, #tpu.memory_space<vmem>>, vector<16x32xf32>
    %17 = arith.truncf %15 : vector<16x128xf32> to vector<16x128xbf16>
    %c0_7 = arith.constant 0 : index
    %c0_8 = arith.constant 0 : index
    %18 = vector.load %arg4[%c0_7, %c0_8] : memref<128x32xbf16, #tpu.memory_space<vmem>>, vector<128x32xbf16>
    %cst_9 = arith.constant dense<0.000000e+00> : vector<16x32xf32>
    %19 = tpu.matmul %17, %18, %cst_9 {dimension_numbers = #tpu.dot_dimension_numbers<[1], [0], [0], [1], [0, 0, 1, 1], [], []>} : vector<16x128xbf16>, vector<128x32xbf16>, vector<16x32xf32> -> vector<16x32xf32>
    %20 = arith.addf %16, %19 : vector<16x32xf32>
    %c0_10 = arith.constant 0 : index
    %c0_11 = arith.constant 0 : index
    %21 = vector.load %arg6[%c0_10, %c0_11] : memref<16x32xf32, #tpu.memory_space<vmem>>, vector<16x32xf32>
    tpu.vector_store %arg6[%c0_10, %c0_11], %20 {strides = array<i32>} : memref<16x32xf32, #tpu.memory_space<vmem>>, vector<16x32xf32>,
    %c0_i32_12 = arith.constant 0 : i32
    %22 = arith.cmpi eq, %arg1, %c0_i32_12 : i32
    %23 = arith.extui %22 : i1 to i32
    %c0_i32_13 = arith.constant 0 : i32
    %24 = arith.cmpi ne, %23, %c0_i32_13 : i32
    scf.if %24 {
      %c0_14 = arith.constant 0 : index
      %c0_15 = arith.constant 0 : index
      %25 = vector.load %arg6[%c0_14, %c0_15] : memref<16x32xf32, #tpu.memory_space<vmem>>, vector<16x32xf32>
      %c0_16 = arith.constant 0 : index
      %c0_17 = arith.constant 0 : index
      %26 = vector.load %arg5[%c0_16, %c0_17] : memref<16x32xf32, #tpu.memory_space<vmem>>, vector<16x32xf32>
      tpu.vector_store %arg5[%c0_16, %c0_17], %25 {strides = array<i32>} : memref<16x32xf32, #tpu.memory_space<vmem>>, vector<16x32xf32>,
    } else {
    }
    return
  }
  func.func @transform_0(%arg0: i32, %arg1: i32) -> (i32, i32) {
    %c0_i32 = arith.constant 0 : i32
    %c0_i32_0 = arith.constant 0 : i32
    return %arg0, %c0_i32 : i32, i32
  }
  func.func @transform_1(%arg0: i32, %arg1: i32) -> (i32, i32) {
    %c0_i32 = arith.constant 0 : i32
    %c0_i32_0 = arith.constant 0 : i32
    return %c0_i32, %arg1 : i32, i32
  }
  func.func @transform_2(%arg0: i32, %arg1: i32) -> (i32, i32) {
    %c0_i32 = arith.constant 0 : i32
    %c0_i32_0 = arith.constant 0 : i32
    return %arg1, %c0_i32 : i32, i32
  }
  func.func @transform_3(%arg0: i32, %arg1: i32) -> (i32, i32) {
    %c0_i32 = arith.constant 0 : i32
    %c0_i32_0 = arith.constant 0 : i32
    return %arg0, %c0_i32 : i32, i32
  }
}

</mosaic_0001>

<bundles_post_ra>
// kernel: tpu_custom_call.1
= control target key start
LH: loop header
LB: loop body
LE: loop exit
PB: predicated region body
PF: predicated region fallthrough
CT: control target
= control target key end

     0   :  { %v342_v2 = vmov 0   ;;  %vm20_vm0 = vcmask 261120   ;;  %s420_s0 = inlined_call_operand.vmem [shape: f32[16,32], index: 0, kind: input, shape index: {}]   ;;  %s421_s1 = inlined_call_operand.vmem [shape: bf16[32,256], index: 1, kind: input, shape index: {}]   ;;  %s422_s2 = inlined_call_operand.vmem [shape: bf16[128,32], index: 2, kind: input, shape index: {}]   ;;  %s423_s3 = inlined_call_operand.hbm [shape: f32[16,32], index: 3, kind: output, shape index: {}]  }
   0x1   :  { %v298_v0 = vld [vmem:[%s421_s1 + $0x14] ss:$8 sps:$4 sm:$0xff]   ;;  %v300_v1 = vld [vmem:[%s421_s1 + $0x10] ss:$8 sps:$4 sm:$0xff]   ;;  %86 = vmatprep.mubr.bf16.mxu0 %v342_v2  ;;  %v301_v3 = vld [vmem:[%s421_s1 + $0x4] ss:$8 sps:$4 sm:$0xff]  }
   0x2   :  { %66 = vmatprep.subr.bf16.mxu0 %v298_v0  ;;  %v303_v4 = vld [vmem:[%s421_s1] ss:$8 sps:$4 sm:$0xff]  }
   0x3   :  { %v23_v5 = vld [vmem:[%s420_s0] sm:$0xff]  ;;  %67 = vmatpush1.bf16.msra.mxu0 %v300_v1  ;;  %v24_v6 = vld [vmem:[%s420_s0 + $0x8] sm:$0xff] }
   0x4   :  { %68 = vmatprep.subr.bf16.mxu0 %v301_v3  ;;  %v25_v7 = vpack.c.bf16 %v24_v6, %v23_v5 }
   0x7   :  { %69 = vmatpush1.bf16.msra.mxu0 %v303_v4 }
   0x8   :  { %8 = vsyncpa [#allocation4], 0  ;;  %v304_v8 = vld [vmem:[%s422_s2 + $0x38] sm:$0xff]   ;;  %v343_v9 = vmov 0.0   ;;  %v305_v10 = vld [vmem:[%s422_s2 + $0x30] sm:$0xff]   ;;  %vm344_vm1 = vmmov 0  }
   0x9   :  { %272 = vmatprep.subr.bf16.mxu1 %v343_v9  ;;  %21 = vst.msk [vmem:[#allocation2] sm:$0xff] %vm20_vm0, %v343_v9  ;;  %22 = vst.msk [vmem:[#allocation2 + $0x8] sm:$0xff] %vm20_vm0, %v343_v9  ;;  %v306_v11 = vld [vmem:[%s422_s2 + $0x28] sm:$0xff]   ;;  %v307_v12 = vld [vmem:[%s422_s2 + $0x20] sm:$0xff]   ;;  %288 = vmatprep.mubr.msk.bf16.mxu1 %vm344_vm1, %v343_v9 }
   0xa   :  { %252 = vmatmul.mubr.msk.bf16.vlgmr.msra.gmra.mxu0 %vm20_vm0, %v25_v7  ;;  %273 = vmatpush3.bf16.msra.mxu1 %v304_v8  ;;  %v308_v13 = vld [vmem:[%s422_s2 + $0x18] sm:$0xff]   ;;  %v309_v14 = vld [vmem:[%s422_s2 + $0x10] sm:$0xff]   ;;  %v310_v15 = vld [vmem:[%s422_s2 + $0x8] sm:$0xff]  }
   0xb   :  { %274 = vmatprep.subr.bf16.mxu1 %v343_v9  ;;  %v311_v16 = vld [vmem:[%s422_s2] sm:$0xff]   ;;  %s345_s2 = smov [#allocation3]  }
   0xc   :  { %s237_s11 = sshll.u32 %s345_s2, 4  ;;  %s238_s11 = int_to_ptr.vmem [resolvable:$true] %s237_s11 }
   0xd   :  { %s320_s12 = scalar_lea.vmem %s238_s11, 256  ;;  %p325_p1 = scmp.lt.s32.totalorder %s238_s11, %s238_s11 }
   0xe   :  { %275 = vmatpush3.bf16.msra.mxu1 %v305_v10  ;;  %p321_p0 = scmp.ne.s32.totalorder %s238_s11, %s320_s12  ;;  %p326_p2 = scmp.lt.s32.totalorder %s320_s12, %s320_s12 }
   0xf   :  { %276 = vmatprep.subr.bf16.mxu1 %v343_v9 }
  0x10   :  { %v113_v34 = vld [vmem:[#allocation2] sm:$0xff]  ;;  %v114_v38 = vld [vmem:[#allocation2 + $0x8] sm:$0xff]  ;;  %p327_p3 = por %p326_p2, %p325_p1 }
  0x12   :  { %277 = vmatpush3.bf16.msra.mxu1 %v306_v11  ;;  %p328_p4 = pnand %p327_p3, %p321_p0 }
  0x13   :  { %278 = vmatprep.subr.bf16.mxu1 %v343_v9 }
  0x16   :  { %279 = vmatpush3.bf16.msra.mxu1 %v307_v12 }
  0x17   :  { %280 = vmatprep.subr.bf16.mxu1 %v343_v9 }
  0x1a   :  { %281 = vmatpush3.bf16.msra.mxu1 %v308_v13 }
  0x1b   :  { %282 = vmatprep.subr.bf16.mxu1 %v343_v9 }
  0x1e   :  { %283 = vmatpush3.bf16.msra.mxu1 %v309_v14 }
  0x1f   :  { %284 = vmatprep.subr.bf16.mxu1 %v343_v9 }
  0x22   :  { %285 = vmatpush3.bf16.msra.mxu1 %v310_v15 }
  0x23   :  { %286 = vmatprep.subr.bf16.mxu1 %v343_v9 }
  0x26   :  { %287 = vmatpush3.bf16.msra.mxu1 %v311_v16 }
  0xca   :  { %v88_v17 = vpop.f32.mrf.mxu0 }
  0xcc   :  { %v90_v18 = vpop.f32.mrf.mxu0 }
  0xcd   :  { %v253_v19 = vmul.f32 -1.442695, %v90_v18 }
  0xce   :  { %v92_v20 = vpop.f32.mrf.mxu0 }
  0xcf   :  { %312 = vpow2.f32 %v253_v19 }
  0xd0   :  { %v94_v21 = vpop.f32.mrf.mxu0 }
  0xd1   :  { %v254_v22 = vmul.f32 -1.442695, %v94_v21 }
  0xd3   :  { %314 = vpow2.f32 %v254_v22 }
  0xdc   :  { %v313_v23 = vpop.eup %312 }
  0xdd   :  { %v103_v24 = vadd.f32 1.0, %v313_v23 }
  0xdf   :  { %316 = vrcp.f32 %v103_v24 }
  0xe0   :  { %v315_v25 = vpop.eup %314 }
  0xe1   :  { %v104_v26 = vadd.f32 1.0, %v315_v25 }
  0xe3   :  { %318 = vrcp.f32 %v104_v26 }
  0xec   :  { %v317_v27 = vpop.eup %316 }
  0xed   :  { %v109_v28 = vmul.f32 %v317_v27, %v90_v18 }
  0xef   :  { %v111_v31 = vmul.f32 %v109_v28, %v88_v17 }
  0xf0   :  { %v319_v29 = vpop.eup %318 }
  0xf1   :  { %v110_v30 = vmul.f32 %v319_v29, %v94_v21 }
  0xf3   :  { %v112_v32 = vmul.f32 %v110_v30, %v92_v20 }
  0xf5   :  { %v115_v33 = vpack.c.bf16 %v112_v32, %v111_v31 }
  0xf7   :  { %289 = vmatmul.mubr.bf16.vlgmr.msra.gmra.mxu1 %v115_v33 }
 0x1b7   :  { %v214_v35 = vpop.f32.mrf.mxu1 }
 0x1b8   :  { %v221_v36 = vadd.f32 %v214_v35, %v113_v34 }
 0x1b9   :  { %v290_v37 = vpop.f32.mrf.mxu1 }
 0x1ba   :  { %223 = vst.msk [vmem:[#allocation2] sm:$0xff] %vm20_vm0, %v221_v36 }
 0x1bb   :  { %v217_v39 = vpop.f32.mrf.mxu1 }
 0x1bc   :  { %v222_v40 = vadd.f32 %v217_v39, %v114_v38 }
 0x1bd   :  { %v291_v41 = vpop.f32.mrf.mxu1 }
 0x1be   :  { %224 = vst.msk [vmem:[#allocation2 + $0x8] sm:$0xff] %vm20_vm0, %v222_v40 }
 0x1c1   :  { %v228_v42 = vld [vmem:[#allocation2] sm:$0xff] }
 0x1c2   :  { %230 = vst.msk [vmem:[#allocation3] sm:$0xff] %vm20_vm0, %v228_v42 }
 0x1c5   :  { %v229_v43 = vld [vmem:[#allocation2 + $0x8] sm:$0xff] }
 0x1c6   :  { %231 = vst.msk [vmem:[#allocation3 + $0x8] sm:$0xff] %vm20_vm0, %v229_v43 }
 0x1c7   :  { %331 = shalt.err (!%p328_p4)
}
 0x1c8   :  { %s346_s13 = smov 128   ;;  %s347_s14 = smov 8  }
 0x1c9   :  { %243 = dma.vmem_to_hbm [thread:$0]  %s238_s11, 256, %s423_s3, [#allocation4], %s346_s13, %s346_s13, %s347_s14  }
 0x1ca   :  { %340 = dma.done.wait [#allocation4], 256  }
 0x1cb   :  { %341 = vsyncadd [#allocation4], 4294967040 }
 0x1cc   :  { %247 = vsyncpa [#allocation4], 1 }

</bundles_post_ra>
